<compile_context>
chip_gen: v5e
topology: v5e:2x2
jax: 0.10.0
libtpu: 0.0.40
codegen_flags: <defaults>
</compile_context>

<pallas_src>
import functools

import jax
import jax.numpy as jnp
from jax.experimental import pallas as pl
from jax.experimental.pallas import tpu as pltpu

LANES = 128                 # lane width
TARGET_TILE_BYTES = 1 << 20  # ~1 MiB per input per pipeline buffer


def _num_tensorcores() -> int:
    """Best-effort TensorCores-per-chip query (2 on v7x, 1 on v5e/v6e).

    Falls back to 1 if the runtime does not expose a core count; the kernel is
    correct either way, the multi-core split is purely a perf optimization.
    """
    try:
        dev = jax.devices()[0]
    except Exception:
        return 1
    for attr in ("num_cores", "num_cores_per_chip", "core_count"):
        v = getattr(dev, attr, None)
        if isinstance(v, int) and v in (1, 2):
            return v
    return 1


def _consistency_loss_kernel(x_ref, t_ref, o_ref, *,
                             rows_valid, tile_rows, total_blocks,
                             blocks_per_split):
    """Accumulate per-core partial sums of BCE(sigmoid(x), sigmoid(t))."""
    c = pl.program_id(0)                 # split (core) index
    j = pl.program_id(1)                 # block index within this split
    b = c * blocks_per_split + j         # global (unclamped) block index

    @pl.when(j == 0)
    def _():
        o_ref[...] = jnp.zeros_like(o_ref)

    x = x_ref[...].astype(jnp.float32)
    t = t_ref[...].astype(jnp.float32)

    q = jax.nn.sigmoid(t)                                   # 1 EUP op

    # softplus(x) = max(x, 0) + log(1 + exp(-|x|))          # 1 exp + 1 log
    #   -log(sigmoid(x))     = softplus(-x)
    #   -log(1 - sigmoid(x)) = softplus(x)
    sp = jnp.log(1.0 + jnp.exp(-jnp.abs(x)))
    softplus_pos = jnp.maximum(x, 0.0) + sp
    softplus_neg = softplus_pos - x
    # PyTorch binary_cross_entropy clamps each log term at -100.
    per_elem = (q * jnp.minimum(softplus_neg, jnp.float32(100.0)) +
                (1.0 - q) * jnp.minimum(softplus_pos, jnp.float32(100.0)))

    is_last = b == (total_blocks - 1)
    is_valid = b < total_blocks          # overshoot blocks (uneven split) skip

    # Steady state: full tiles, no mask; fold to a (1, LANES) lane vector and
    # accumulate into the resident output block.
    @pl.when(jnp.logical_and(is_valid, jnp.logical_not(is_last)))
    def _():
        o_ref[...] += jnp.sum(per_elem, axis=0, keepdims=True)

    # Only the globally-last block can be a partial tile (its padded rows hold
    # arbitrary bits); mask by global row index.  A select (not a multiply) is
    # used so NaN/Inf garbage cannot propagate.
    @pl.when(is_last)
    def _():
        rid = jax.lax.broadcasted_iota(jnp.int32, per_elem.shape, 0)
        valid = (b * tile_rows + rid) < rows_valid
        o_ref[...] += jnp.sum(jnp.where(valid, per_elem, jnp.float32(0.0)),
                              axis=0, keepdims=True)


def _per_elem_bce_of_sigmoids(x, t):
    """Exact per-element BCE(sigmoid(x), sigmoid(t)) with the -100 log clamp."""
    x = x.astype(jnp.float32)
    t = t.astype(jnp.float32)
    q = jax.nn.sigmoid(t)
    softplus_pos = jnp.logaddexp(0.0, x)      # -log(1 - sigmoid(x))
    softplus_neg = jnp.logaddexp(0.0, -x)     # -log(sigmoid(x))
    return (q * jnp.minimum(softplus_neg, 100.0) +
            (1.0 - q) * jnp.minimum(softplus_pos, 100.0))


def consistency_loss(inp, target):
    assert inp.shape == target.shape
    n = inp.size

    # Native dtype all the way to the kernel (in-register upcast there).
    x = inp.reshape(-1)
    t = target.reshape(-1)

    rows = n // LANES
    rem = n - rows * LANES

    # <=127-element lane tail handled in plain JAX: avoids any full-array pad.
    tail_sum = jnp.float32(0.0)
    if rem:
        tail_sum = jnp.sum(_per_elem_bce_of_sigmoids(x[rows * LANES:],
                                                     t[rows * LANES:]))
    if rows == 0:
        return tail_sum / jnp.float32(n)

    # Lane-aligned prefix.  When n % 128 == 0 this is the whole array and the
    # reshape is a free bitcast (zero-copy).  When misaligned, only the prefix
    # slice is staged; no padded full-array copy is ever made.
    x2 = x[:rows * LANES].reshape(rows, LANES)
    t2 = t[:rows * LANES].reshape(rows, LANES)

    # Dtype-aware tile sizing: ~TARGET_TILE_BYTES per input per pipeline
    # buffer (2048 rows f32, 4096 rows bf16).  Multiple of 16 for sub-32-bit
    # sublane packing; a single whole-array block is allowed regardless.
    itemsize = jnp.dtype(inp.dtype).itemsize
    max_rows = max(int(TARGET_TILE_BYTES // (LANES * itemsize)), 16)
    max_rows -= max_rows % 16
    tile_rows = rows if rows <= max_rows else max_rows
    total_blocks = pl.cdiv(rows, tile_rows)

    n_cores = _num_tensorcores()
    splits = n_cores if total_blocks >= n_cores else 1
    blocks_per_split = pl.cdiv(total_blocks, splits)

    def in_map(c, j):
        b = c * blocks_per_split + j
        # Clamp overshoot blocks (uneven split) onto the last real block; the
        # kernel skips their accumulation.
        return (jnp.minimum(b, total_blocks - 1), 0)

    kernel = functools.partial(
        _consistency_loss_kernel,
        rows_valid=rows,
        tile_rows=tile_rows,
        total_blocks=total_blocks,
        blocks_per_split=blocks_per_split,
    )

    if splits > 1:
        dim_sem = (pltpu.CORE_PARALLEL, pltpu.ARBITRARY)   # v7x: both TCs
    else:
        dim_sem = (pltpu.ARBITRARY, pltpu.ARBITRARY)

    partials = pl.pallas_call(
        kernel,
        out_shape=jax.ShapeDtypeStruct((splits, LANES), jnp.float32),
        grid_spec=pltpu.PrefetchScalarGridSpec(
            num_scalar_prefetch=0,
            grid=(splits, blocks_per_split),
            in_specs=[
                pl.BlockSpec((tile_rows, LANES), in_map),
                pl.BlockSpec((tile_rows, LANES), in_map),
            ],
            out_specs=pl.BlockSpec((1, LANES), lambda c, j: (c, 0)),
        ),
        compiler_params=pltpu.CompilerParams(dimension_semantics=dim_sem),
    )(x2, t2)

    # Tiny final reduction over (splits, 128) lane partials + the lane tail.
    return (jnp.sum(partials) + tail_sum) / jnp.float32(n)


def _reference_consistency_loss(inp, target):
    return jnp.mean(_per_elem_bce_of_sigmoids(inp, target))


if __name__ == "__main__":
    key = jax.random.PRNGKey(0)
    keys = jax.random.split(key, 8)

    def check(inp, tgt, name):
        loss = consistency_loss(inp, tgt)
        jax.block_until_ready(loss)
        ref = _reference_consistency_loss(inp, tgt)
        assert jnp.allclose(loss, ref, rtol=1e-4, atol=1e-6), (name, loss, ref)

    # 1) NCHW segmentation-logit shape (lane-aligned, single tile).
    inp = jax.random.normal(keys[0], (2, 4, 16, 16), dtype=jnp.float32) * 3.0
    tgt = jax.random.normal(keys[1], (2, 4, 16, 16), dtype=jnp.float32) * 3.0
    check(inp, tgt, "aligned-small")

    # 2) Misaligned size: exercises the plain-JAX lane tail (n % 128 = 84).
    inp = jax.random.normal(keys[2], (1, 3, 100, 223), dtype=jnp.float32) * 3.0
    tgt = jax.random.normal(keys[3], (1, 3, 100, 223), dtype=jnp.float32) * 3.0
    check(inp, tgt, "misaligned")

    # 3) Multi-block grid with a partial final tile (rows = 2080 > 2048).
    inp = jax.random.normal(keys[4], (4, 4, 128, 130), dtype=jnp.float32) * 3.0
    tgt = jax.random.normal(keys[5], (4, 4, 128, 130), dtype=jnp.float32) * 3.0
    check(inp, tgt, "multi-block")

    # 4) bf16 inputs: native-dtype DMA + dtype-aware tile sizing.
    inp = (jax.random.normal(keys[6], (2, 4, 32, 32), dtype=jnp.float32) * 3.0
           ).astype(jnp.bfloat16)
    tgt = (jax.random.normal(keys[7], (2, 4, 32, 32), dtype=jnp.float32) * 3.0
           ).astype(jnp.bfloat16)
    check(inp, tgt, "bf16")

    print("KERNEL_OK")
</pallas_src>

<mosaic_0001>
module attributes {stable_mosaic.version = 11 : i64} {
  func.func @_consistency_loss_kernel(%arg0: i32, %arg1: i32, %arg2: memref<16x128xf32, #tpu.memory_space<vmem>>, %arg3: memref<16x128xf32, #tpu.memory_space<vmem>>, %arg4: memref<1x128xf32, #tpu.memory_space<vmem>>) attributes {dimension_semantics = [#tpu.dimension_semantics<arbitrary>, #tpu.dimension_semantics<arbitrary>], iteration_bounds = array<i64: 1, 1>, scalar_prefetch = 0 : i64, scratch_operands = 0 : i64, tpu.core_type = #tpu.core_type<tc>, window_params = [{transform_indices = @transform_0, window_bounds = array<i64: 16, 128>}, {transform_indices = @transform_1, window_bounds = array<i64: 16, 128>}, {transform_indices = @transform_2, window_bounds = array<i64: 1, 128>}]} {
    %c1_i32 = arith.constant 1 : i32
    %0 = arith.muli %arg0, %c1_i32 : i32
    %1 = arith.addi %0, %arg1 : i32
    %c0_i32 = arith.constant 0 : i32
    %2 = arith.cmpi eq, %arg1, %c0_i32 : i32
    %3 = arith.extui %2 : i1 to i32
    %c0_i32_0 = arith.constant 0 : i32
    %4 = arith.cmpi ne, %3, %c0_i32_0 : i32
    scf.if %4 {
      %cst_14 = arith.constant 0.000000e+00 : f32
      %40 = vector.broadcast %cst_14 : f32 to vector<1x128xf32>
      %c0_15 = arith.constant 0 : index
      %c0_16 = arith.constant 0 : index
      %41 = vector.load %arg4[%c0_15, %c0_16] : memref<1x128xf32, #tpu.memory_space<vmem>>, vector<1x128xf32>
      tpu.vector_store %arg4[%c0_15, %c0_16], %40 {strides = array<i32>} : memref<1x128xf32, #tpu.memory_space<vmem>>, vector<1x128xf32>,
    } else {
    }
    %c0 = arith.constant 0 : index
    %c0_1 = arith.constant 0 : index
    %5 = vector.load %arg2[%c0, %c0_1] : memref<16x128xf32, #tpu.memory_space<vmem>>, vector<16x128xf32>
    %c0_2 = arith.constant 0 : index
    %c0_3 = arith.constant 0 : index
    %6 = vector.load %arg3[%c0_2, %c0_3] : memref<16x128xf32, #tpu.memory_space<vmem>>, vector<16x128xf32>
    %7 = arith.negf %6 : vector<16x128xf32>
    %8 = math.exp %7 : vector<16x128xf32>
    %cst = arith.constant 1.000000e+00 : f32
    %9 = vector.broadcast %cst : f32 to vector<16x128xf32>
    %10 = arith.addf %9, %8 : vector<16x128xf32>
    %11 = arith.divf %9, %10 : vector<16x128xf32>
    %12 = math.absf %5 : vector<16x128xf32>
    %cst_4 = arith.constant 0.000000e+00 : f32
    %13 = vector.broadcast %cst_4 : f32 to vector<16x128xf32>
    %14 = arith.subf %13, %12 : vector<16x128xf32>
    %15 = math.exp %14 : vector<16x128xf32>
    %cst_5 = arith.constant 1.000000e+00 : f32
    %16 = vector.broadcast %cst_5 : f32 to vector<16x128xf32>
    %17 = arith.addf %16, %15 : vector<16x128xf32>
    %18 = math.log %17 : vector<16x128xf32>
    %cst_6 = arith.constant 0.000000e+00 : f32
    %19 = vector.broadcast %cst_6 : f32 to vector<16x128xf32>
    %20 = arith.maximumf %5, %19 : vector<16x128xf32>
    %21 = arith.addf %20, %18 : vector<16x128xf32>
    %22 = arith.subf %21, %5 : vector<16x128xf32>
    %cst_7 = arith.constant 1.000000e+02 : f32
    %23 = vector.broadcast %cst_7 : f32 to vector<16x128xf32>
    %24 = arith.minimumf %22, %23 : vector<16x128xf32>
    %25 = arith.mulf %11, %24 : vector<16x128xf32>
    %cst_8 = arith.constant 1.000000e+00 : f32
    %26 = vector.broadcast %cst_8 : f32 to vector<16x128xf32>
    %27 = arith.subf %26, %11 : vector<16x128xf32>
    %cst_9 = arith.constant 1.000000e+02 : f32
    %28 = vector.broadcast %cst_9 : f32 to vector<16x128xf32>
    %29 = arith.minimumf %21, %28 : vector<16x128xf32>
    %30 = arith.mulf %27, %29 : vector<16x128xf32>
    %31 = arith.addf %25, %30 : vector<16x128xf32>
    %c0_i32_10 = arith.constant 0 : i32
    %32 = arith.cmpi eq, %1, %c0_i32_10 : i32
    %c1_i32_11 = arith.constant 1 : i32
    %33 = arith.cmpi slt, %1, %c1_i32_11 : i32
    %true = arith.constant true
    %34 = arith.xori %32, %true : i1
    %35 = arith.andi %33, %34 : i1
    %36 = arith.extui %35 : i1 to i32
    %c0_i32_12 = arith.constant 0 : i32
    %37 = arith.cmpi ne, %36, %c0_i32_12 : i32
    scf.if %37 {
      %c0_14 = arith.constant 0 : index
      %c0_15 = arith.constant 0 : index
      %40 = vector.load %arg4[%c0_14, %c0_15] : memref<1x128xf32, #tpu.memory_space<vmem>>, vector<1x128xf32>
      %cst_16 = arith.constant dense<0.000000e+00> : vector<128xf32>
      %41 = vector.multi_reduction <add>, %31, %cst_16 [0] : vector<16x128xf32> to vector<128xf32>
      %42 = vector.shape_cast %41 : vector<128xf32> to vector<1x128xf32>
      %43 = arith.addf %40, %42 : vector<1x128xf32>
      %c0_17 = arith.constant 0 : index
      %c0_18 = arith.constant 0 : index
      %44 = vector.load %arg4[%c0_17, %c0_18] : memref<1x128xf32, #tpu.memory_space<vmem>>, vector<1x128xf32>
      tpu.vector_store %arg4[%c0_17, %c0_18], %43 {strides = array<i32>} : memref<1x128xf32, #tpu.memory_space<vmem>>, vector<1x128xf32>,
    } else {
    }
    %38 = arith.extui %32 : i1 to i32
    %c0_i32_13 = arith.constant 0 : i32
    %39 = arith.cmpi ne, %38, %c0_i32_13 : i32
    scf.if %39 {
      %40 = tpu.iota {dimensions = array<i32: 0>} : vector<16x128xi32>
      %c16_i32 = arith.constant 16 : i32
      %41 = arith.muli %1, %c16_i32 : i32
      %42 = vector.broadcast %41 : i32 to vector<16x128xi32>
      %43 = arith.addi %42, %40 : vector<16x128xi32>
      %c16_i32_14 = arith.constant 16 : i32
      %44 = vector.broadcast %c16_i32_14 : i32 to vector<16x128xi32>
      %45 = arith.cmpi slt, %43, %44 : vector<16x128xi32>
      %c0_15 = arith.constant 0 : index
      %c0_16 = arith.constant 0 : index
      %46 = vector.load %arg4[%c0_15, %c0_16] : memref<1x128xf32, #tpu.memory_space<vmem>>, vector<1x128xf32>
      %cst_17 = arith.constant 0.000000e+00 : f32
      %47 = vector.broadcast %cst_17 : f32 to vector<16x128xf32>
      %48 = arith.select %45, %31, %47 : vector<16x128xi1>, vector<16x128xf32>
      %cst_18 = arith.constant dense<0.000000e+00> : vector<128xf32>
      %49 = vector.multi_reduction <add>, %48, %cst_18 [0] : vector<16x128xf32> to vector<128xf32>
      %50 = vector.shape_cast %49 : vector<128xf32> to vector<1x128xf32>
      %51 = arith.addf %46, %50 : vector<1x128xf32>
      %c0_19 = arith.constant 0 : index
      %c0_20 = arith.constant 0 : index
      %52 = vector.load %arg4[%c0_19, %c0_20] : memref<1x128xf32, #tpu.memory_space<vmem>>, vector<1x128xf32>
      tpu.vector_store %arg4[%c0_19, %c0_20], %51 {strides = array<i32>} : memref<1x128xf32, #tpu.memory_space<vmem>>, vector<1x128xf32>,
    } else {
    }
    return
  }
  func.func @transform_0(%arg0: i32, %arg1: i32) -> (i32, i32) {
    %c1_i32 = arith.constant 1 : i32
    %0 = arith.muli %arg0, %c1_i32 : i32
    %1 = arith.addi %0, %arg1 : i32
    %c0_i32 = arith.constant 0 : i32
    %2 = arith.minsi %1, %c0_i32 : i32
    %c0_i32_0 = arith.constant 0 : i32
    %c0_i32_1 = arith.constant 0 : i32
    return %2, %c0_i32_0 : i32, i32
  }
  func.func @transform_1(%arg0: i32, %arg1: i32) -> (i32, i32) {
    %c1_i32 = arith.constant 1 : i32
    %0 = arith.muli %arg0, %c1_i32 : i32
    %1 = arith.addi %0, %arg1 : i32
    %c0_i32 = arith.constant 0 : i32
    %2 = arith.minsi %1, %c0_i32 : i32
    %c0_i32_0 = arith.constant 0 : i32
    %c0_i32_1 = arith.constant 0 : i32
    return %2, %c0_i32_0 : i32, i32
  }
  func.func @transform_2(%arg0: i32, %arg1: i32) -> (i32, i32) {
    %c0_i32 = arith.constant 0 : i32
    %c0_i32_0 = arith.constant 0 : i32
    return %arg0, %c0_i32 : i32, i32
  }
}

</mosaic_0001>

<bundles_post_ra>
// kernel: tpu_custom_call.1
= control target key start
LH: loop header
LB: loop body
LE: loop exit
PB: predicated region body
PF: predicated region fallthrough
CT: control target
= control target key end

     0   :  { %7 = vsyncpa [#allocation3], 0  ;;  %s356_s0 = inlined_call_operand.hbm [shape: f32[16,128], index: 0, kind: input, shape index: {}]   ;;  %s357_s1 = inlined_call_operand.hbm [shape: f32[16,128], index: 1, kind: input, shape index: {}]   ;;  %s358_s2 = inlined_call_operand.hbm [shape: f32[1,128], index: 2, kind: output, shape index: {}]  }
   0x1   :  { %8 = vsyncpa [#allocation6], 0 }
   0x2   :  { %9 = vsyncpa [#allocation4], 0  ;;  %s20_s11 = sshll.u32 %s356_s0, 4  ;;  %s309_s12 = smov [#allocation2]   ;;  %s21_s11 = int_to_ptr.hbm [resolvable:$true] %s20_s11 }
   0x3   :  { %s22_s13 = sshll.u32 %s309_s12, 4  ;;  %s39_s16 = sshll.u32 %s357_s1, 4  ;;  %s23_s13 = int_to_ptr.vmem [resolvable:$true] %s22_s13  ;;  %s40_s16 = int_to_ptr.hbm [resolvable:$true] %s39_s16 }
   0x4   :  { %s310_s17 = smov 128   ;;  %s311_s18 = smov 8  }
   0x5   :  { %28 = dma.hbm_to_vmem [thread:$0]  %s21_s11, 256, %s23_s13, [#allocation3], %s310_s17, %s310_s17, %s311_s18  }
   0x6   :  { %s312_s19 = smov [#allocation5]  }
   0x7   :  { %s41_s20 = sshll.u32 %s312_s19, 4  ;;  %s42_s20 = int_to_ptr.vmem [resolvable:$true] %s41_s20 }
   0x8   :  { %47 = dma.hbm_to_vmem [thread:$0]  %s40_s16, 256, %s42_s20, [#allocation6], %s310_s17, %s310_s17, %s311_s18  }
   0x9   :  { %303 = dma.done.wait [#allocation3], 256  }
   0xa   :  { %304 = vsyncadd [#allocation3], 4294967040 }
   0xb   :  { %305 = dma.done.wait [#allocation6], 256  }
   0xc   :  { %306 = vsyncadd [#allocation6], 4294967040  ;;  %v313_v0 = vmov 0.0   ;;  %v336_v1 = vld [vmem:[#allocation2] sm:$0xff]  ;;  %v338_v2 = vld [vmem:[#allocation2 + $0x8] sm:$0xff]  ;;  %s314_s0 = smov [#allocation7]  }
   0xd   :  { %69 = vst [vmem:[#allocation7] sm:$0x1] %v313_v0  ;;  %v72_v3 = vld [vmem:[#allocation5] sm:$0xff]  ;;  %v73_v4 = vld [vmem:[#allocation5 + $0x8] sm:$0xff]  ;;  %v112_v6 = vand.u32 2147483647, %v336_v1 }
   0xe   :  { %v207_v5 = vmul.f32 -1.442695, %v72_v3  ;;  %v208_v7 = vmul.f32 -1.442695, %v73_v4  ;;  %v113_v8 = vand.u32 2147483647, %v338_v2 }
   0xf   :  { %v114_v9 = vsub.f32 0.0, %v112_v6  ;;  %v126_v24 = vmax.f32 %v336_v1, 0.0  ;;  %v127_v27 = vmax.f32 %v338_v2, 0.0  ;;  %s190_s1 = sshll.u32 %s314_s0, 4  ;;  %s192_s23 = sshll.u32 %s358_s2, 4  ;;  %s191_s1 = int_to_ptr.vmem [resolvable:$true] %s190_s1  ;;  %s193_s23 = int_to_ptr.hbm [resolvable:$true] %s192_s23 }
  0x10   :  { %215 = vpow2.f32 %v207_v5  ;;  %v115_v10 = vsub.f32 0.0, %v113_v8 }
  0x11   :  { %217 = vpow2.f32 %v208_v7  ;;  %v116_v11 = vmul.f32 1.442695, %v114_v9 }
  0x12   :  { %v118_v12 = vmul.f32 1.442695, %v115_v10 }
  0x13   :  { %219 = vpow2.f32 %v116_v11 }
  0x14   :  { %221 = vpow2.f32 %v118_v12  ;;  %v173_v7 = vld [vmem:[#allocation7] sm:$0x1] }
  0x16   :  { %v216_v13 = vpop.eup %215 }
  0x17   :  { %v218_v14 = vpop.eup %217  ;;  %v80_v15 = vadd.f32 1.0, %v216_v13 }
  0x18   :  { %v81_v16 = vadd.f32 1.0, %v218_v14 }
  0x19   :  { %223 = vrcp.f32 %v80_v15  ;;  %v220_v17 = vpop.eup %219  ;;  %vm87_vm0 = vweird.f32 %v80_v15  ;;  %v93_v25 = vand.u32 2147483648, %v80_v15  ;;  %v91_v29 = vand.u32 2147483647, %v80_v15 }
  0x1a   :  { %225 = vrcp.f32 %v81_v16  ;;  %v222_v18 = vpop.eup %221  ;;  %v120_v19 = vadd.f32 1.0, %v220_v17  ;;  %v108_v30 = vand.u32 2147483648, %v81_v16  ;;  %vm102_vm2 = vweird.f32 %v81_v16 }
  0x1b   :  { %v121_v20 = vadd.f32 1.0, %v222_v18  ;;  %v106_v33 = vand.u32 2147483647, %v81_v16  ;;  %v94_v38 = vor.u32 1.1754944e-38, %v93_v25  ;;  %vm92_vm5 = vcmp.eq.f32.partialorder %v91_v29, 8.507059e+37 }
  0x1c   :  { %227 = vlog2.f32 %v120_v19  ;;  %v109_v42 = vor.u32 1.1754944e-38, %v108_v30 }
  0x1d   :  { %229 = vlog2.f32 %v121_v20  ;;  %vm107_vm7 = vcmp.eq.f32.partialorder %v106_v33, 8.507059e+37 }
  0x1f   :  { %v224_v21 = vpop.eup %223 }
  0x20   :  { %v226_v22 = vpop.eup %225  ;;  %v83_v23 = vmul.f32 %v224_v21, %v80_v15  ;;  %vm88_vm1 = vweird.f32 %v224_v21 }
  0x21   :  { %v98_v26 = vmul.f32 %v226_v22, %v81_v16  ;;  %vm103_vm3 = vweird.f32 %v226_v22  ;;  %vm345_vm4 = vmor %vm87_vm0, %vm88_vm1 }
  0x22   :  { %v84_v28 = vsub.f32 1.0, %v83_v23  ;;  %v228_v31 = vpop.eup %227  ;;  %vm104_vm6 = vmor %vm102_vm2, %vm103_vm3 }
  0x23   :  { %v99_v32 = vsub.f32 1.0, %v98_v26  ;;  %v230_v34 = vpop.eup %229  ;;  %v123_v36 = vmul.f32 0.6931472, %v228_v31 }
  0x24   :  { %v85_v35 = vmul.f32 %v224_v21, %v84_v28  ;;  %v125_v40 = vmul.f32 0.6931472, %v230_v34 }
  0x25   :  { %v100_v39 = vmul.f32 %v226_v22, %v99_v32  ;;  %v128_v43 = vadd.f32 %v126_v24, %v123_v36 }
  0x26   :  { %v86_v41 = vadd.f32 %v224_v21, %v85_v35  ;;  %v129_v45 = vadd.f32 %v127_v27, %v125_v40 }
  0x27   :  { %v101_v44 = vadd.f32 %v226_v22, %v100_v39  ;;  %v130_v47 = vsub.f32 %v128_v43, %v336_v1  ;;  %v138_v48 = vmin.f32 %v128_v43, 100.0 }
  0x28   :  { %v90_v46 = vsel %vm345_vm4, %v224_v21, %v86_v41  ;;  %v131_v51 = vsub.f32 %v129_v45, %v338_v2  ;;  %v139_v52 = vmin.f32 %v129_v45, 100.0 }
  0x29   :  { %v95_v49 = vsel %vm92_vm5, %v94_v38, %v90_v46  ;;  %v105_v50 = vsel %vm104_vm6, %v226_v22, %v101_v44  ;;  %v132_v54 = vmin.f32 %v130_v47, 100.0 }
  0x2a   :  { %v110_v53 = vsel %vm107_vm7, %v109_v42, %v105_v50  ;;  %v136_v55 = vsub.f32 1.0, %v95_v49  ;;  %v133_v56 = vmin.f32 %v131_v51, 100.0 }
  0x2b   :  { %v137_v57 = vsub.f32 1.0, %v110_v53  ;;  %v134_v58 = vmul.f32 %v132_v54, %v95_v49 }
  0x2c   :  { %v140_v59 = vmul.f32 %v138_v48, %v136_v55  ;;  %v135_v60 = vmul.f32 %v133_v56, %v110_v53 }
  0x2d   :  { %v141_v61 = vmul.f32 %v139_v52, %v137_v57 }
  0x2e   :  { %v142_v62 = vadd.f32 %v140_v59, %v134_v58 }
  0x2f   :  { %v143_v63 = vadd.f32 %v141_v61, %v135_v60 }
  0x31   :  { %v176_v0 = vadd.f32 %v143_v63, %v142_v62 }
  0x33   :  { %v177_v3 = vrot.slane %v176_v0, 4 }
  0x35   :  { %v178_v1 = vadd.f32 %v177_v3, %v176_v0 }
  0x37   :  { %v179_v4 = vrot.slane %v178_v1, 2 }
  0x39   :  { %v180_v5 = vadd.f32 %v179_v4, %v178_v1 }
  0x3b   :  { %v181_v6 = vrot.slane %v180_v5, 1 }
  0x3d   :  { %v182_v2 = vadd.f32 %v181_v6, %v180_v5 }
  0x3f   :  { %v183_v8 = vadd.f32 %v182_v2, %v173_v7 }
  0x41   :  { %184 = vst [vmem:[#allocation7] sm:$0x1] %v183_v8 }
  0x42   :  { %195 = dma.vmem_to_hbm [thread:$0]  %s191_s1, 16, %s193_s23, [#allocation4]  }
  0x43   :  { %307 = dma.done.wait [#allocation4], 16  }
  0x44   :  { %308 = vsyncadd [#allocation4], 4294967280 }
  0x45   :  { %200 = vsyncpa [#allocation3], 1 }
  0x46   :  { %201 = vsyncpa [#allocation6], 1 }
  0x47   :  { %202 = vsyncpa [#allocation4], 1 }

</bundles_post_ra>
